<compile_context>
chip_gen: v7x
topology: tpu7x:2x2x1
jax: 0.10.0
libtpu: 0.0.40
codegen_flags: <defaults>
</compile_context>

<pallas_src>
import functools
import math

import jax
import jax.numpy as jnp
from jax.experimental import pallas as pl
from jax.experimental.pallas import tpu as pltpu

_INV_SQRT2 = 0.7071067811865476       # 1/sqrt(2), folded into a multiply
_SQRT_2_OVER_PI = 0.7978845608028654  # sqrt(2/pi) for tanh-GELU
_GELU_C = 0.044715


def _round_up(v, m):
    return ((v + m - 1) // m) * m


def projection_head_kernel(x_ref, w1_ref, w2_ref, params_ref, o_ref, *, exact_gelu):
    x = x_ref[...]                       # [TM, E] f32 batch tile (pipelined)
    w1 = w1_ref[...]                     # [E, P]  resident (bf16 or f32)
    w2 = w2_ref[...]                     # [P, P]  resident (bf16 or f32)
    params = params_ref[...]             # [4, P]  f32: b1, b2, gamma, beta
    b1, b2 = params[0:1], params[1:2]
    gamma, beta = params[2:3], params[3:4]

    # projected = self.projection(x)
    projected = jnp.dot(x.astype(w1.dtype), w1,
                        preferred_element_type=jnp.float32) + b1

    # x = self.gelu(projected)
    if exact_gelu:
        # PyTorch nn.GELU() default (exact erf) -- heavier VPU polynomial.
        h = 0.5 * projected * (1.0 + jax.lax.erf(projected * _INV_SQRT2))
    else:
        # tanh approximation: transcendental runs on the EUP slot, few VALU ops.
        inner = _SQRT_2_OVER_PI * projected * (1.0 + _GELU_C * projected * projected)
        h = 0.5 * projected * (1.0 + jnp.tanh(inner))

    # x = self.fc(x)
    y = jnp.dot(h.astype(w2.dtype), w2,
                preferred_element_type=jnp.float32) + b2

    # x = self.dropout(x) -> p=0.0, identity in both train/eval.
    # TODO(synk): dropout with p>0 (training) would need pltpu PRNG; omitted since p=0.0.

    # x = x + projected
    y = y + projected

    # x = self.layer_norm(x): over last dim, eps=1e-5. P is a multiple of 128,
    # so the lane reduction has no padded lanes to exclude.
    mean = jnp.mean(y, axis=-1, keepdims=True)
    centered = y - mean
    var = jnp.mean(centered * centered, axis=-1, keepdims=True)
    inv = jax.lax.rsqrt(var + 1e-5)
    o_ref[...] = (centered * inv * gamma + beta).astype(o_ref.dtype)


_BUFFERED = getattr(pl, "Buffered", None)


def _resident_spec(shape):
    """Constant-index (VMEM-resident) block; single-buffered when supported."""
    if _BUFFERED is not None:
        try:
            return pl.BlockSpec(shape, lambda i: (0, 0), pipeline_mode=_BUFFERED(1))
        except TypeError:
            pass
    return pl.BlockSpec(shape, lambda i: (0, 0))


def projection_head(x, w1, b1, w2, b2, gamma, beta, *, tm=512,
                    use_bf16_matmul=True, exact_gelu=False):
    """x: [B, E]; w1: [E, P]; w2: [P, P]; b1/b2/gamma/beta: [P]. Returns [B, P] f32."""
    B, E = x.shape
    P = w1.shape[1]

    # --- precision of MXU operands (f32 accumulate either way) ----------------
    matmul_dtype = jnp.bfloat16 if use_bf16_matmul else jnp.float32
    w1c = w1.astype(matmul_dtype)   # cast once here, not per grid step in-kernel
    w2c = w2.astype(matmul_dtype)
    params = jnp.stack([b1.reshape(-1), b2.reshape(-1),
                        gamma.reshape(-1), beta.reshape(-1)], axis=0)  # [4, P] f32

    # --- batch tiling ----------------------------------------------------------
    # Cap tm so x/out tiles (double-buffered) + f32 intermediates stay well under
    # the scoped VMEM limit even for large P (intermediates live in VMEM, not vregs).
    per_row_bytes = 4 * (2 * E + 2 * P) + 4 * 4 * P
    tm = max(8, min(tm, (24 * (1 << 20) // per_row_bytes) // 8 * 8))

    n_tiles = pl.cdiv(B, tm)
    if n_tiles == 1 and B > 8:
        n_tiles = 2  # v7x: >=2 grid steps so the "parallel" axis spans both TensorCores
    tm_eff = _round_up(pl.cdiv(B, n_tiles), 8)   # padding-aware tile: <=7 wasted rows
    b_pad = n_tiles * tm_eff
    if b_pad != B:
        x = jnp.pad(x, ((0, b_pad - B), (0, 0)))

    # --- VMEM budget / cost hints ---------------------------------------------
    w_itemsize = jnp.dtype(matmul_dtype).itemsize
    est_vmem = ((E * P + P * P) * w_itemsize       # resident weights (single-buffered)
                + 8 * P * 4                        # packed params (sublane-padded)
                + 2 * tm_eff * (E + P) * 4         # double-buffered x / out tiles
                + 5 * tm_eff * P * 4)              # f32 intermediates
    vmem_limit = int(min(64 * (1 << 20), max(32 * (1 << 20), 2 * est_vmem)))

    flops = 2 * b_pad * E * P + 2 * b_pad * P * P + 12 * b_pad * P
    bytes_accessed = (b_pad * E * 4 + (E * P + P * P) * w_itemsize
                      + 4 * P * 4 + b_pad * P * 4)

    kernel = functools.partial(projection_head_kernel, exact_gelu=exact_gelu)

    out = pl.pallas_call(
        kernel,
        out_shape=jax.ShapeDtypeStruct((b_pad, P), jnp.float32),
        grid_spec=pltpu.PrefetchScalarGridSpec(
            num_scalar_prefetch=0,
            grid=(n_tiles,),
            in_specs=[
                pl.BlockSpec((tm_eff, E), lambda i: (i, 0)),  # x batch tile (pipelined)
                _resident_spec((E, P)),                       # w1
                _resident_spec((P, P)),                       # w2
                # TODO(synk): K-tile the second matmul (grid axis over P-chunks,
                # f32 accumulator + pl.when init/finalize) if P grows enough that
                # w2 alone nears the v7x resident budget (~4k for bf16).
                _resident_spec((4, P)),                       # [b1; b2; gamma; beta]
            ],
            out_specs=pl.BlockSpec((tm_eff, P), lambda i: (i, 0)),
        ),
        compiler_params=pltpu.CompilerParams(
            dimension_semantics=("parallel",),
            vmem_limit_bytes=vmem_limit),
        cost_estimate=pl.CostEstimate(
            flops=flops, transcendentals=b_pad * P, bytes_accessed=bytes_accessed),
    )(x, w1c, w2c, params)

    return out[:B]


def _init_linear(key, fan_in, fan_out):
    # PyTorch nn.Linear default init: U(-1/sqrt(fan_in), 1/sqrt(fan_in))
    kw, kb = jax.random.split(key)
    bound = 1.0 / math.sqrt(fan_in)
    w = jax.random.uniform(kw, (fan_in, fan_out), jnp.float32, -bound, bound)
    b = jax.random.uniform(kb, (fan_out,), jnp.float32, -bound, bound)
    return w, b


def _reference(x, w1, b1, w2, b2, gamma, beta):
    # Exact PyTorch semantics: f32 matmuls + erf GELU + LayerNorm(eps=1e-5).
    proj = x @ w1 + b1
    h = 0.5 * proj * (1.0 + jax.lax.erf(proj * _INV_SQRT2))
    y = h @ w2 + b2 + proj
    mu = y.mean(-1, keepdims=True)
    var = ((y - mu) ** 2).mean(-1, keepdims=True)
    return (y - mu) / jnp.sqrt(var + 1e-5) * gamma + beta


if __name__ == "__main__":
    embedding_dim = 32
    projection_dim = 256

    key = jax.random.PRNGKey(0)
    kx, k1, k2, kx2 = jax.random.split(key, 4)

    w1, b1 = _init_linear(k1, embedding_dim, projection_dim)
    w2, b2 = _init_linear(k2, projection_dim, projection_dim)
    gamma = jnp.ones((projection_dim,), jnp.float32)
    beta = jnp.zeros((projection_dim,), jnp.float32)

    x_small = jax.random.normal(kx, (8, embedding_dim), jnp.float32)
    x_big = jax.random.normal(kx2, (200, embedding_dim), jnp.float32)
    ref_small = _reference(x_small, w1, b1, w2, b2, gamma, beta)
    ref_big = _reference(x_big, w1, b1, w2, b2, gamma, beta)

    # Exact-parity path (f32 MXU operands + erf GELU) -> tight tolerance.
    out = projection_head(x_small, w1, b1, w2, b2, gamma, beta,
                          use_bf16_matmul=False, exact_gelu=True)
    jax.block_until_ready(out)
    assert out.shape == ref_small.shape
    assert jnp.allclose(out, ref_small, atol=1e-4, rtol=1e-4), "exact small-batch mismatch"

    out = projection_head(x_big, w1, b1, w2, b2, gamma, beta,
                          use_bf16_matmul=False, exact_gelu=True)
    jax.block_until_ready(out)
    assert jnp.allclose(out, ref_big, atol=1e-4, rtol=1e-4), "exact tiled-batch mismatch"

    # Default fast path (bf16 MXU operands + tanh GELU) -> small numeric drift.
    out = projection_head(x_small, w1, b1, w2, b2, gamma, beta)
    jax.block_until_ready(out)
    assert jnp.allclose(out, ref_small, atol=3e-2, rtol=3e-2), "fast small-batch mismatch"

    out = projection_head(x_big, w1, b1, w2, b2, gamma, beta)
    jax.block_until_ready(out)
    assert jnp.allclose(out, ref_big, atol=3e-2, rtol=3e-2), "fast tiled-batch mismatch"

    print("KERNEL_OK")
</pallas_src>

<mosaic_0001>
module attributes {stable_mosaic.version = 11 : i64} {
  func.func @projection_head_kernel(%arg0: i32, %arg1: memref<8x32xf32, #tpu.memory_space<vmem>>, %arg2: memref<32x256xf32, #tpu.memory_space<vmem>>, %arg3: memref<256x256xf32, #tpu.memory_space<vmem>>, %arg4: memref<4x256xf32, #tpu.memory_space<vmem>>, %arg5: memref<8x256xf32, #tpu.memory_space<vmem>>) attributes {dimension_semantics = [#tpu.dimension_semantics<parallel>], iteration_bounds = array<i64: 1>, scalar_prefetch = 0 : i64, scratch_operands = 0 : i64, tpu.core_type = #tpu.core_type<tc>, window_params = [{transform_indices = @transform_0, window_bounds = array<i64: 8, 32>}, {pipeline_mode = #tpu.pipeline_mode<synchronous>, transform_indices = @transform_1, window_bounds = array<i64: 32, 256>}, {pipeline_mode = #tpu.pipeline_mode<synchronous>, transform_indices = @transform_2, window_bounds = array<i64: 256, 256>}, {pipeline_mode = #tpu.pipeline_mode<synchronous>, transform_indices = @transform_3, window_bounds = array<i64: 4, 256>}, {transform_indices = @transform_4, window_bounds = array<i64: 8, 256>}]} {
    %c0 = arith.constant 0 : index
    %c0_0 = arith.constant 0 : index
    %0 = vector.load %arg1[%c0, %c0_0] : memref<8x32xf32, #tpu.memory_space<vmem>>, vector<8x32xf32>
    %c0_1 = arith.constant 0 : index
    %c0_2 = arith.constant 0 : index
    %1 = vector.load %arg2[%c0_1, %c0_2] : memref<32x256xf32, #tpu.memory_space<vmem>>, vector<32x256xf32>
    %c0_3 = arith.constant 0 : index
    %c0_4 = arith.constant 0 : index
    %2 = vector.load %arg3[%c0_3, %c0_4] : memref<256x256xf32, #tpu.memory_space<vmem>>, vector<256x256xf32>
    %c0_5 = arith.constant 0 : index
    %c0_6 = arith.constant 0 : index
    %3 = vector.load %arg4[%c0_5, %c0_6] : memref<4x256xf32, #tpu.memory_space<vmem>>, vector<4x256xf32>
    %4 = vector.extract_strided_slice %3 {offsets = [0, 0], sizes = [1, 256], strides = [1, 1]} : vector<4x256xf32> to vector<1x256xf32>
    %5 = vector.extract_strided_slice %3 {offsets = [1, 0], sizes = [1, 256], strides = [1, 1]} : vector<4x256xf32> to vector<1x256xf32>
    %6 = vector.extract_strided_slice %3 {offsets = [2, 0], sizes = [1, 256], strides = [1, 1]} : vector<4x256xf32> to vector<1x256xf32>
    %7 = vector.extract_strided_slice %3 {offsets = [3, 0], sizes = [1, 256], strides = [1, 1]} : vector<4x256xf32> to vector<1x256xf32>
    %cst = arith.constant dense<0.000000e+00> : vector<8x256xf32>
    %8 = tpu.matmul %0, %1, %cst {dimension_numbers = #tpu.dot_dimension_numbers<[1], [0], [0], [1], [0, 0, 1, 1], [], []>} : vector<8x32xf32>, vector<32x256xf32>, vector<8x256xf32> -> vector<8x256xf32>
    %9 = vector.broadcast %4 : vector<1x256xf32> to vector<8x256xf32>
    %10 = arith.addf %8, %9 : vector<8x256xf32>
    %cst_7 = arith.constant 5.000000e-01 : f32
    %11 = vector.broadcast %cst_7 : f32 to vector<8x256xf32>
    %12 = arith.mulf %11, %10 : vector<8x256xf32>
    %cst_8 = arith.constant 0.707106769 : f32
    %13 = vector.broadcast %cst_8 : f32 to vector<8x256xf32>
    %14 = arith.mulf %10, %13 : vector<8x256xf32>
    %15 = math.erf %14 : vector<8x256xf32>
    %cst_9 = arith.constant 1.000000e+00 : f32
    %16 = vector.broadcast %cst_9 : f32 to vector<8x256xf32>
    %17 = arith.addf %16, %15 : vector<8x256xf32>
    %18 = arith.mulf %12, %17 : vector<8x256xf32>
    %cst_10 = arith.constant dense<0.000000e+00> : vector<8x256xf32>
    %19 = tpu.matmul %18, %2, %cst_10 {dimension_numbers = #tpu.dot_dimension_numbers<[1], [0], [0], [1], [0, 0, 1, 1], [], []>} : vector<8x256xf32>, vector<256x256xf32>, vector<8x256xf32> -> vector<8x256xf32>
    %20 = vector.broadcast %5 : vector<1x256xf32> to vector<8x256xf32>
    %21 = arith.addf %19, %20 : vector<8x256xf32>
    %22 = arith.addf %21, %10 : vector<8x256xf32>
    %cst_11 = arith.constant dense<0.000000e+00> : vector<8xf32>
    %23 = vector.multi_reduction <add>, %22, %cst_11 [1] : vector<8x256xf32> to vector<8xf32>
    %24 = vector.shape_cast %23 : vector<8xf32> to vector<8x1xf32>
    %cst_12 = arith.constant 2.560000e+02 : f32
    %25 = vector.broadcast %cst_12 : f32 to vector<8x1xf32>
    %26 = arith.divf %24, %25 : vector<8x1xf32>
    %27 = vector.broadcast %26 : vector<8x1xf32> to vector<8x256xf32>
    %28 = arith.subf %22, %27 : vector<8x256xf32>
    %29 = arith.mulf %28, %28 : vector<8x256xf32>
    %cst_13 = arith.constant dense<0.000000e+00> : vector<8xf32>
    %30 = vector.multi_reduction <add>, %29, %cst_13 [1] : vector<8x256xf32> to vector<8xf32>
    %31 = vector.shape_cast %30 : vector<8xf32> to vector<8x1xf32>
    %cst_14 = arith.constant 2.560000e+02 : f32
    %32 = vector.broadcast %cst_14 : f32 to vector<8x1xf32>
    %33 = arith.divf %31, %32 : vector<8x1xf32>
    %cst_15 = arith.constant 9.99999974E-6 : f32
    %34 = vector.broadcast %cst_15 : f32 to vector<8x1xf32>
    %35 = arith.addf %33, %34 : vector<8x1xf32>
    %36 = math.rsqrt %35 : vector<8x1xf32>
    %37 = vector.broadcast %36 : vector<8x1xf32> to vector<8x256xf32>
    %38 = arith.mulf %28, %37 : vector<8x256xf32>
    %39 = vector.broadcast %6 : vector<1x256xf32> to vector<8x256xf32>
    %40 = arith.mulf %38, %39 : vector<8x256xf32>
    %41 = vector.broadcast %7 : vector<1x256xf32> to vector<8x256xf32>
    %42 = arith.addf %40, %41 : vector<8x256xf32>
    %c0_16 = arith.constant 0 : index
    %c0_17 = arith.constant 0 : index
    %43 = vector.load %arg5[%c0_16, %c0_17] : memref<8x256xf32, #tpu.memory_space<vmem>>, vector<8x256xf32>
    tpu.vector_store %arg5[%c0_16, %c0_17], %42 {strides = array<i32>} : memref<8x256xf32, #tpu.memory_space<vmem>>, vector<8x256xf32>,
    return
  }
  func.func @transform_0(%arg0: i32) -> (i32, i32) {
    %c0_i32 = arith.constant 0 : i32
    %c0_i32_0 = arith.constant 0 : i32
    return %arg0, %c0_i32 : i32, i32
  }
  func.func @transform_1(%arg0: i32) -> (i32, i32) {
    %c0_i32 = arith.constant 0 : i32
    %c0_i32_0 = arith.constant 0 : i32
    %c0_i32_1 = arith.constant 0 : i32
    return %c0_i32, %c0_i32_0 : i32, i32
  }
  func.func @transform_2(%arg0: i32) -> (i32, i32) {
    %c0_i32 = arith.constant 0 : i32
    %c0_i32_0 = arith.constant 0 : i32
    %c0_i32_1 = arith.constant 0 : i32
    return %c0_i32, %c0_i32_0 : i32, i32
  }
  func.func @transform_3(%arg0: i32) -> (i32, i32) {
    %c0_i32 = arith.constant 0 : i32
    %c0_i32_0 = arith.constant 0 : i32
    %c0_i32_1 = arith.constant 0 : i32
    return %c0_i32, %c0_i32_0 : i32, i32
  }
  func.func @transform_4(%arg0: i32) -> (i32, i32) {
    %c0_i32 = arith.constant 0 : i32
    %c0_i32_0 = arith.constant 0 : i32
    return %arg0, %c0_i32 : i32, i32
  }
}

</mosaic_0001>

<bundles_post_ra>
// kernel: tpu_custom_call.1
= control target key start
LH: loop header
LB: loop body
LE: loop exit
PB: predicated region body
PF: predicated region fallthrough
CT: control target
= control target key end

     0   :  { %9 = vsyncpa [#allocation3], 0  ;;  %s680_s0 = inlined_call_operand.hbm [shape: f32[8,32], index: 0, kind: input, shape index: {}]   ;;  %s681_s1 = inlined_call_operand.hbm [shape: f32[32,256], index: 1, kind: input, shape index: {}]   ;;  %s682_s2 = inlined_call_operand.hbm [shape: f32[256,256], index: 2, kind: input, shape index: {}]   ;;  %s683_s3 = inlined_call_operand.vmem [shape: f32[4,256], index: 3, kind: input, shape index: {}]   ;;  %s684_s4 = inlined_call_operand.hbm [shape: f32[8,256], index: 4, kind: output, shape index: {}]  }
   0x1   :  { %10 = vsyncpa [#allocation6], 0 }
   0x2   :  { %11 = vsyncpa [#allocation4], 0  ;;  %s581_s15 = smov [#allocation5]   ;;  %s487_s19 = scalar_lea.hbm %s681_s1, 1024 }
   0x3   :  { %s27_s16 = sshll.u32 %s581_s15, 4  ;;  %p488_p0 = scmp.ne.s32.totalorder %s681_s1, %s487_s19  ;;  %s28_s16 = int_to_ptr.vmem [resolvable:$true] %s27_s16 }
   0x4   :  { %p491_p1 = scmp.lt.u32.totalorder %s487_s19, %s681_s1 }
   0x6   :  { %p493_p2 = pnand %p491_p1, %p488_p0 }
   0x8   :  { %496 = shalt.err (!%p493_p2)
}
   0x9   :  { %s497_s24 = scalar_lea.vmem %s28_s16, 1024  ;;  %p502_p4 = scmp.lt.s32.totalorder %s28_s16, %s28_s16 }
   0xa   :  { %p498_p3 = scmp.ne.s32.totalorder %s28_s16, %s497_s24  ;;  %p503_p5 = scmp.lt.s32.totalorder %s497_s24, %s497_s24 }
   0xc   :  { %p504_p6 = por %p503_p5, %p502_p4 }
   0xe   :  { %p505_p7 = pnand %p504_p6, %p498_p3 }
  0x10   :  { %508 = shalt.err (!%p505_p7)
}
  0x11   :  { %s582_s25 = smov 256   ;;  %s583_s26 = smov 16  }
  0x12   :  { %33 = dma.hbm_to_vmem [thread:$0]  %s681_s1, 1024, %s28_s16, [#allocation6], %s582_s25, %s582_s25, %s583_s26  }
  0x13   :  { %s584_s29 = smov [#allocation2]   ;;  %s585_s5 = smov [#allocation7]  }
  0x14   :  { %s18_s30 = sshll.u32 %s584_s29, 4  ;;  %s39_s6 = sshll.u32 %s585_s5, 4  ;;  %s19_s30 = int_to_ptr.vmem [resolvable:$true] %s18_s30  ;;  %s40_s6 = int_to_ptr.vmem [resolvable:$true] %s39_s6 }
  0x15   :  { %s509_s9 = scalar_lea.hbm %s680_s0, 128 }
  0x16   :  { %p510_p8 = scmp.ne.s32.totalorder %s680_s0, %s509_s9  ;;  %p513_p9 = scmp.lt.u32.totalorder %s509_s9, %s680_s0 }
  0x18   :  { %p515_p10 = pnand %p513_p9, %p510_p8 }
  0x1a   :  { %518 = shalt.err (!%p515_p10)
}
  0x1b   :  { %s519_s1 = scalar_lea.vmem %s19_s30, 128  ;;  %p524_p12 = scmp.lt.s32.totalorder %s19_s30, %s19_s30 }
  0x1c   :  { %p520_p11 = scmp.ne.s32.totalorder %s19_s30, %s519_s1  ;;  %p525_p13 = scmp.lt.s32.totalorder %s519_s1, %s519_s1 }
  0x1e   :  { %p526_p0 = por %p525_p13, %p524_p12 }
  0x20   :  { %p527_p1 = pnand %p526_p0, %p520_p11 }
  0x22   :  { %530 = shalt.err (!%p527_p1)
}
  0x23   :  { %21 = dma.hbm_to_vmem [thread:$0]  %s680_s0, 128, %s19_s30, [#allocation3]  }
  0x24   :  { %s531_s18 = scalar_lea.hbm %s682_s2, 8192 }
  0x25   :  { %p532_p2 = scmp.ne.s32.totalorder %s682_s2, %s531_s18  ;;  %p535_p3 = scmp.lt.u32.totalorder %s531_s18, %s682_s2 }
  0x27   :  { %p537_p4 = pnand %p535_p3, %p532_p2 }
  0x29   :  { %540 = shalt.err (!%p537_p4)
}
  0x2a   :  { %s541_s23 = scalar_lea.vmem %s40_s6, 8192  ;;  %p546_p6 = scmp.lt.s32.totalorder %s40_s6, %s40_s6 }
  0x2b   :  { %p542_p5 = scmp.ne.s32.totalorder %s40_s6, %s541_s23  ;;  %p547_p7 = scmp.lt.s32.totalorder %s541_s23, %s541_s23 }
  0x2d   :  { %p548_p8 = por %p547_p7, %p546_p6 }
  0x2f   :  { %p549_p9 = pnand %p548_p8, %p542_p5 }
  0x31   :  { %552 = shalt.err (!%p549_p9)
}
  0x32   :  { %45 = dma.hbm_to_vmem [thread:$0]  %s682_s2, 8192, %s40_s6, [#allocation6], %s582_s25, %s582_s25, %s583_s26  }
  0x33   :  { %575 = dma.done.wait [#allocation3], 128  }
  0x34   :  { %576 = vsyncadd [#allocation3], 4294967168 }
  0x35   :  { %577 = dma.done.wait [#allocation6], 9216  }
  0x36   :  { %578 = vsyncadd [#allocation6], 4294958080  ;;  %v586_v0 = vmov 0.0   ;;  %v59_v1 = vld [vmem:[#allocation5 + $0x8] sm:$0xff]  ;;  %v61_v2 = vld [vmem:[#allocation5 + $0x18] sm:$0xff]  ;;  %vm150_vm0 = vcmask 261120  }
  0x37   :  { %218 = vmatprep.mubr.f32.mxu0 %v586_v0  ;;  %v58_v3 = vld [vmem:[#allocation5] sm:$0xff]  ;;  %v402_v4 = vpack.c.bf16 %v61_v2, %v59_v1  ;;  %v60_v5 = vld [vmem:[#allocation5 + $0x10] sm:$0xff]  ;;  %v63_v6 = vld [vmem:[#allocation5 + $0x28] sm:$0xff] }
  0x38   :  { %v65_v7 = vld [vmem:[#allocation5 + $0x38] sm:$0xff]  ;;  %v404_v8 = vpack.c.bf16 %v60_v5, %v58_v3  ;;  %v62_v10 = vld [vmem:[#allocation5 + $0x20] sm:$0xff]  ;;  %v64_v11 = vld [vmem:[#allocation5 + $0x30] sm:$0xff] }
  0x39   :  { %v406_v9 = vpack.c.bf16 %v65_v7, %v63_v6  ;;  %403 = vmatprep.subr.bf16.mxu0 %v402_v4  ;;  %v67_v12 = vld [vmem:[#allocation7 + $0x8] sm:$0xff]  ;;  %v69_v13 = vld [vmem:[#allocation7 + $0x18] sm:$0xff]  ;;  %v66_v14 = vld [vmem:[#allocation7] sm:$0xff]  ;;  %v408_v15 = vpack.c.bf16 %v64_v11, %v62_v10 }
  0x3a   :  { %405 = vmatpush1.bf16.msra.mxu0 %v404_v8  ;;  %v410_v16 = vpack.c.bf16 %v69_v13, %v67_v12  ;;  %v68_v17 = vld [vmem:[#allocation7 + $0x10] sm:$0xff]  ;;  %v71_v18 = vld [vmem:[#allocation7 + $0x28] sm:$0xff]  ;;  %v73_v19 = vld [vmem:[#allocation7 + $0x38] sm:$0xff] }
  0x3b   :  { %407 = vmatprep.subr.bf16.mxu0 %v406_v9  ;;  %v412_v20 = vpack.c.bf16 %v68_v17, %v66_v14  ;;  %v414_v21 = vpack.c.bf16 %v73_v19, %v71_v18  ;;  %v70_v22 = vld [vmem:[#allocation7 + $0x20] sm:$0xff]  ;;  %v72_v23 = vld [vmem:[#allocation7 + $0x30] sm:$0xff]  ;;  %v75_v24 = vld [vmem:[#allocation7 + $0x48] sm:$0xff] }
  0x3c   :  { %411 = vmatprep.subr.bf16.mxu1 %v410_v16  ;;  %v77_v25 = vld [vmem:[#allocation7 + $0x58] sm:$0xff]  ;;  %v416_v26 = vpack.c.bf16 %v72_v23, %v70_v22  ;;  %v74_v29 = vld [vmem:[#allocation7 + $0x40] sm:$0xff]  ;;  %v76_v30 = vld [vmem:[#allocation7 + $0x50] sm:$0xff] }
  0x3d   :  { %413 = vmatpush1.bf16.msra.mxu1 %v412_v20  ;;  %v57_v27 = vld [vmem:[#allocation2] sm:$0xff]  ;;  %v418_v28 = vpack.c.bf16 %v77_v25, %v75_v24  ;;  %v79_v31 = vld [vmem:[#allocation7 + $0x68] sm:$0xff]  ;;  %v420_v33 = vpack.c.bf16 %v76_v30, %v74_v29  ;;  %v78_v35 = vld [vmem:[#allocation7 + $0x60] sm:$0xff] }
  0x3e   :  { %409 = vmatpush1.bf16.msra.mxu0 %v408_v15  ;;  %415 = vmatprep.subr.bf16.mxu1 %v414_v21  ;;  %v81_v32 = vld [vmem:[#allocation7 + $0x78] sm:$0xff]  ;;  %v80_v36 = vld [vmem:[#allocation7 + $0x70] sm:$0xff]  ;;  %v83_v37 = vld [vmem:[#allocation7 + $0x88] sm:$0xff] }
  0x3f   :  { %v422_v34 = vpack.c.bf16 %v81_v32, %v79_v31  ;;  %v85_v38 = vld [vmem:[#allocation7 + $0x98] sm:$0xff]  ;;  %v424_v39 = vpack.c.bf16 %v80_v36, %v78_v35  ;;  %v82_v41 = vld [vmem:[#allocation7 + $0x80] sm:$0xff]  ;;  %v84_v42 = vld [vmem:[#allocation7 + $0x90] sm:$0xff] }
  0x40   :  { %v426_v40 = vpack.c.bf16 %v85_v38, %v83_v37  ;;  %v87_v43 = vld [vmem:[#allocation7 + $0xa8] sm:$0xff]  ;;  %v89_v44 = vld [vmem:[#allocation7 + $0xb8] sm:$0xff]  ;;  %v428_v45 = vpack.c.bf16 %v84_v42, %v82_v41  ;;  %v86_v47 = vld [vmem:[#allocation7 + $0xa0] sm:$0xff] }
  0x41   :  { %401 = vmatmul.mubr.msk.f32.vlgmr.msra.gmra.mrb[0].mxu0 %vm150_vm0, %v57_v27  ;;  %417 = vmatpush1.bf16.msra.mxu1 %v416_v26  ;;  %v430_v46 = vpack.c.bf16 %v89_v44, %v87_v43  ;;  %v88_v48 = vld [vmem:[#allocation7 + $0xb0] sm:$0xff]  ;;  %v91_v49 = vld [vmem:[#allocation7 + $0xc8] sm:$0xff]  ;;  %v93_v50 = vld [vmem:[#allocation7 + $0xd8] sm:$0xff] }
  0x42   :  { %419 = vmatprep.subr.bf16.mxu1 %v418_v28  ;;  %v432_v51 = vpack.c.bf16 %v88_v48, %v86_v47  ;;  %v434_v52 = vpack.c.bf16 %v93_v50, %v91_v49  ;;  %v90_v53 = vld [vmem:[#allocation7 + $0xc0] sm:$0xff]  ;;  %v92_v54 = vld [vmem:[#allocation7 + $0xd0] sm:$0xff]  ;;  %v95_v55 = vld [vmem:[#allocation7 + $0xe8] sm:$0xff] }
  0x43   :  { %v97_v56 = vld [vmem:[#allocation7 + $0xf8] sm:$0xff]  ;;  %v436_v57 = vpack.c.bf16 %v92_v54, %v90_v53  ;;  %v94_v59 = vld [vmem:[#allocation7 + $0xe0] sm:$0xff]  ;;  %v96_v60 = vld [vmem:[#allocation7 + $0xf0] sm:$0xff] }
  0x44   :  { %v438_v58 = vpack.c.bf16 %v97_v56, %v95_v55  ;;  %v99_v61 = vld [vmem:[#allocation7 + $0x108] sm:$0xff]  ;;  %v101_v62 = vld [vmem:[#allocation7 + $0x118] sm:$0xff]  ;;  %v440_v63 = vpack.c.bf16 %v96_v60, %v94_v59  ;;  %v98_v1 = vld [vmem:[#allocation7 + $0x100] sm:$0xff] }
  0x45   :  { %421 = vmatpush1.bf16.msra.mxu1 %v420_v33  ;;  %v442_v0 = vpack.c.bf16 %v101_v62, %v99_v61  ;;  %v100_v2 = vld [vmem:[#allocation7 + $0x110] sm:$0xff]  ;;  %v103_v3 = vld [vmem:[#allocation7 + $0x128] sm:$0xff]  ;;  %v105_v4 = vld [vmem:[#allocation7 + $0x138] sm:$0xff] }
  0x46   :  { %423 = vmatprep.subr.bf16.mxu1 %v422_v34  ;;  %v444_v5 = vpack.c.bf16 %v100_v2, %v98_v1  ;;  %v446_v6 = vpack.c.bf16 %v105_v4, %v103_v3  ;;  %v102_v7 = vld [vmem:[#allocation7 + $0x120] sm:$0xff]  ;;  %v104_v8 = vld [vmem:[#allocation7 + $0x130] sm:$0xff]  ;;  %v107_v9 = vld [vmem:[#allocation7 + $0x148] sm:$0xff] }
  0x47   :  { %v109_v10 = vld [vmem:[#allocation7 + $0x158] sm:$0xff]  ;;  %v448_v11 = vpack.c.bf16 %v104_v8, %v102_v7  ;;  %v106_v13 = vld [vmem:[#allocation7 + $0x140] sm:$0xff]  ;;  %v108_v14 = vld [vmem:[#allocation7 + $0x150] sm:$0xff] }
  0x48   :  { %v450_v12 = vpack.c.bf16 %v109_v10, %v107_v9  ;;  %v452_v15 = vpack.c.bf16 %v108_v14, %v106_v13  ;;  %v111_v16 = vld [vmem:[#allocation7 + $0x168] sm:$0xff]  ;;  %v113_v17 = vld [vmem:[#allocation7 + $0x178] sm:$0xff]  ;;  %v110_v19 = vld [vmem:[#allocation7 + $0x160] sm:$0xff] }
  0x49   :  { %425 = vmatpush1.bf16.msra.mxu1 %v424_v39  ;;  %v454_v18 = vpack.c.bf16 %v113_v17, %v111_v16  ;;  %v112_v20 = vld [vmem:[#allocation7 + $0x170] sm:$0xff]  ;;  %v115_v22 = vld [vmem:[#allocation7 + $0x188] sm:$0xff]  ;;  %v117_v23 = vld [vmem:[#allocation7 + $0x198] sm:$0xff] }
  0x4a   :  { %427 = vmatprep.subr.bf16.mxu1 %v426_v40  ;;  %v456_v21 = vpack.c.bf16 %v112_v20, %v110_v19  ;;  %v458_v24 = vpack.c.bf16 %v117_v23, %v115_v22  ;;  %v114_v25 = vld [vmem:[#allocation7 + $0x180] sm:$0xff]  ;;  %v116_v26 = vld [vmem:[#allocation7 + $0x190] sm:$0xff]  ;;  %v119_v28 = vld [vmem:[#allocation7 + $0x1a8] sm:$0xff] }
  0x4b   :  { %v460_v27 = vpack.c.bf16 %v116_v26, %v114_v25  ;;  %v121_v29 = vld [vmem:[#allocation7 + $0x1b8] sm:$0xff]  ;;  %v118_v30 = vld [vmem:[#allocation7 + $0x1a0] sm:$0xff]  ;;  %v120_v32 = vld [vmem:[#allocation7 + $0x1b0] sm:$0xff] }
  0x4c   :  { %v462_v31 = vpack.c.bf16 %v121_v29, %v119_v28  ;;  %v123_v33 = vld [vmem:[#allocation7 + $0x1c8] sm:$0xff]  ;;  %v125_v34 = vld [vmem:[#allocation7 + $0x1d8] sm:$0xff]  ;;  %v464_v35 = vpack.c.bf16 %v120_v32, %v118_v30  ;;  %v122_v37 = vld [vmem:[#allocation7 + $0x1c0] sm:$0xff] }
  0x4d   :  { %429 = vmatpush1.bf16.msra.mxu1 %v428_v45  ;;  %v466_v36 = vpack.c.bf16 %v125_v34, %v123_v33  ;;  %v124_v38 = vld [vmem:[#allocation7 + $0x1d0] sm:$0xff]  ;;  %v127_v39 = vld [vmem:[#allocation7 + $0x1e8] sm:$0xff]  ;;  %v129_v40 = vld [vmem:[#allocation7 + $0x1f8] sm:$0xff] }
  0x4e   :  { %431 = vmatprep.subr.bf16.mxu1 %v430_v46  ;;  %v468_v41 = vpack.c.bf16 %v124_v38, %v122_v37  ;;  %v470_v42 = vpack.c.bf16 %v129_v40, %v127_v39  ;;  %v126_v43 = vld [vmem:[#allocation7 + $0x1e0] sm:$0xff]  ;;  %v128_v44 = vld [vmem:[#allocation7 + $0x1f0] sm:$0xff]  ;;  %v132_v46 = vlaneseq  ;;  %v658_v49 = vld [vmem:[%s683_s3] sm:$0xff]  ;;  %s587_s3 = smov [#allocation8]  }
  0x4f   :  { %v472_v45 = vpack.c.bf16 %v128_v44, %v126_v43  ;;  %s391_s26 = sshll.u32 %s587_s3, 4  ;;  %s392_s26 = int_to_ptr.vmem [resolvable:$true] %s391_s26 }
  0x50   :  { %v133_v47 = vshrl.u32 %v132_v46, 7  ;;  %s553_s27 = scalar_lea.vmem %s392_s26, 256  ;;  %p558_p11 = scmp.lt.s32.totalorder %s392_s26, %s392_s26 }
  0x51   :  { %433 = vmatpush1.bf16.msra.mxu1 %v432_v51  ;;  %p554_p10 = scmp.ne.s32.totalorder %s392_s26, %s553_s27  ;;  %p559_p12 = scmp.lt.s32.totalorder %s553_s27, %s553_s27 }
  0x52   :  { %435 = vmatprep.subr.bf16.mxu1 %v434_v52  ;;  %v134_v48 = vsub.s32 0, %v133_v47  ;;  %v138_v50 = vsub.s32 4, %v133_v47  ;;  %v345_v28 = vsub.s32 2, %v133_v47  ;;  %v349_v29 = vsub.s32 6, %v133_v47 }
  0x53   :  { %v365_v30 = vsub.s32 3, %v133_v47  ;;  %p560_p13 = por %p559_p12, %p558_p11 }
  0x54   :  { %v135_v51 = vrot.slane %v658_v49, %v134_v48  ;;  %v139_v52 = vrot.slane %v658_v49, %v138_v50  ;;  %v346_v32 = vrot.slane %v658_v49, %v345_v28  ;;  %v350_v33 = vrot.slane %v658_v49, %v349_v29 }
  0x55   :  { %437 = vmatpush1.bf16.msra.mxu1 %v436_v57  ;;  %v366_v34 = vrot.slane %v658_v49, %v365_v30  ;;  %p561_p0 = pnand %p560_p13, %p554_p10 }
  0x56   :  { %439 = vmatprep.subr.bf16.mxu1 %v438_v58  ;;  %v145_v53 = vrot.slane %v135_v51, %v134_v48  ;;  %v149_v54 = vrot.slane %v139_v52, %v134_v48  ;;  %v360_v37 = vrot.slane %v350_v33, %v345_v28 }
  0x59   :  { %441 = vmatpush1.bf16.msra.mxu1 %v440_v63 }
  0x5a   :  { %443 = vmatprep.subr.bf16.mxu1 %v442_v0 }
  0x5d   :  { %445 = vmatpush1.bf16.msra.mxu1 %v444_v5  ;;  %v237_v5 = vsub.s32 1, %v133_v47 }
  0x5e   :  { %447 = vmatprep.subr.bf16.mxu1 %v446_v6  ;;  %v241_v6 = vsub.s32 5, %v133_v47 }
  0x5f   :  { %v238_v7 = vrot.slane %v658_v49, %v237_v5 }
  0x60   :  { %v242_v8 = vrot.slane %v658_v49, %v241_v6 }
  0x61   :  { %449 = vmatpush1.bf16.msra.mxu1 %v448_v11  ;;  %v248_v9 = vrot.slane %v238_v7, %v237_v5 }
  0x62   :  { %451 = vmatprep.subr.bf16.mxu1 %v450_v12  ;;  %v252_v10 = vrot.slane %v242_v8, %v237_v5 }
  0x65   :  { %453 = vmatpush1.bf16.msra.mxu1 %v452_v15 }
  0x66   :  { %455 = vmatprep.subr.bf16.mxu1 %v454_v18 }
  0x69   :  { %457 = vmatpush1.bf16.msra.mxu1 %v456_v21 }
  0x6a   :  { %459 = vmatprep.subr.bf16.mxu1 %v458_v24 }
  0x6d   :  { %461 = vmatpush1.bf16.msra.mxu1 %v460_v27 }
  0x6e   :  { %463 = vmatprep.subr.bf16.mxu1 %v462_v31  ;;  %v369_v31 = vsub.s32 7, %v133_v47 }
  0x71   :  { %465 = vmatpush1.bf16.msra.mxu1 %v464_v35  ;;  %v370_v35 = vrot.slane %v658_v49, %v369_v31 }
  0x72   :  { %467 = vmatprep.subr.bf16.mxu1 %v466_v36  ;;  %v356_v36 = vrot.slane %v346_v32, %v345_v28 }
  0x75   :  { %469 = vmatpush1.bf16.msra.mxu1 %v468_v41  ;;  %v376_v41 = vrot.slane %v366_v34, %v365_v30 }
  0x76   :  { %471 = vmatprep.subr.bf16.mxu1 %v470_v42  ;;  %v380_v42 = vrot.slane %v370_v35, %v365_v30 }
  0x79   :  { %473 = vmatpush1.bf16.msra.mxu1 %v472_v45 }
 0x114   :  { %v220_v55 = vpop.f32.mrb[0].mxu0 }
 0x115   :  { %v221_v56 = vadd.f32 %v220_v55, %v145_v53  ;;  %v222_v57 = vpop.f32.mrb[1].mxu0 }
 0x116   :  { %v223_v58 = vadd.f32 %v222_v57, %v149_v54 }
 0x117   :  { %v227_v59 = vmul.f32 0.70710677, %v221_v56  ;;  %v225_v2 = vmul.f32 0.5, %v221_v56 }
 0x118   :  { %v228_v60 = vmul.f32 0.70710677, %v223_v58  ;;  %v226_v0 = vmul.f32 0.5, %v223_v58 }
 0x119   :  { %481 = verf.f32 %v227_v59 }
 0x11a   :  { %483 = verf.f32 %v228_v60 }
 0x123   :  { %v482_v61 = vpop.eup %481 }
 0x124   :  { %v484_v62 = vpop.eup %483  ;;  %v231_v63 = vadd.f32 1.0, %v482_v61 }
 0x125   :  { %v232_v1 = vadd.f32 1.0, %v484_v62 }
 0x126   :  { %v233_v4 = vmul.f32 %v231_v63, %v225_v2 }
 0x127   :  { %v234_v3 = vmul.f32 %v232_v1, %v226_v0 }
 0x129   :  { %317 = vmatprep.mubr.f32.mxu1 %v234_v3 }
 0x12a   :  { %318 = vmatmul.mubr.f32.vlgmr.msra.gmra.mrb[0].mxu1 %v233_v4 }
 0x1fd   :  { %v319_v11 = vpop.f32.mrb[0].mxu1 }
 0x1fe   :  { %v320_v12 = vadd.f32 %v319_v11, %v248_v9  ;;  %v321_v13 = vpop.f32.mrb[1].mxu1 }
 0x1ff   :  { %v322_v14 = vadd.f32 %v321_v13, %v252_v10 }
 0x200   :  { %v324_v15 = vadd.f32 %v320_v12, %v221_v56 }
 0x201   :  { %v325_v16 = vadd.f32 %v322_v14, %v223_v58 }
 0x203   :  { %v326_v17 = vadd.f32 %v325_v16, %v324_v15 }
 0x205   :  { %327 = vadd.xlane.f32.xlu0 %v326_v17 }
 0x292   :  { %v328_v18 = vpop.xlane.xlu0 %327 }
 0x293   :  { %v330_v19 = vmul.f32 0.00390625, %v328_v18 }
 0x295   :  { %v331_v20 = vsub.f32 %v324_v15, %v330_v19  ;;  %v332_v21 = vsub.f32 %v325_v16, %v330_v19 }
 0x297   :  { %v333_v22 = vmul.f32 %v331_v20, %v331_v20  ;;  %v334_v23 = vmul.f32 %v332_v21, %v332_v21 }
 0x299   :  { %v335_v24 = vadd.f32 %v334_v23, %v333_v22 }
 0x29b   :  { %336 = vadd.xlane.f32.xlu0 %v335_v24 }
 0x328   :  { %v337_v25 = vpop.xlane.xlu0 %336 }
 0x329   :  { %v338_v26 = vmul.f32 0.00390625, %v337_v25 }
 0x32b   :  { %v339_v27 = vadd.f32 1e-05, %v338_v26 }
 0x32d   :  { %485 = vrsqrt.f32 %v339_v27 }
 0x337   :  { %v486_v38 = vpop.eup %485 }
 0x338   :  { %v341_v39 = vmul.f32 %v486_v38, %v331_v20  ;;  %v342_v40 = vmul.f32 %v486_v38, %v332_v21 }
 0x33a   :  { %v361_v43 = vmul.f32 %v356_v36, %v341_v39  ;;  %v362_v44 = vmul.f32 %v360_v37, %v342_v40 }
 0x33c   :  { %v381_v45 = vadd.f32 %v376_v41, %v361_v43  ;;  %v382_v46 = vadd.f32 %v380_v42, %v362_v44 }
 0x33e   :  { %383 = vst [vmem:[#allocation8] sm:$0xff] %v381_v45  ;;  %384 = vst [vmem:[#allocation8 + $0x8] sm:$0xff] %v382_v46 }
 0x33f   :  { %564 = shalt.err (!%p561_p0)
}
 0x340   :  { %s565_s30 = scalar_lea.hbm %s684_s4, 256 }
 0x341   :  { %p566_p1 = scmp.ne.s32.totalorder %s684_s4, %s565_s30  ;;  %p569_p2 = scmp.lt.u32.totalorder %s565_s30, %s684_s4 }
 0x343   :  { %p571_p3 = pnand %p569_p2, %p566_p1 }
 0x345   :  { %574 = shalt.err (!%p571_p3)
}
 0x346   :  { %394 = dma.vmem_to_hbm [thread:$0]  %s392_s26, 256, %s684_s4, [#allocation4]  }
 0x347   :  { %579 = dma.done.wait [#allocation4], 256  }
 0x348   :  { %580 = vsyncadd [#allocation4], 4294967040 }
 0x349   :  { %398 = vsyncpa [#allocation3], 1 }
 0x34a   :  { %399 = vsyncpa [#allocation6], 1 }
 0x34b   :  { %400 = vsyncpa [#allocation4], 1 }

</bundles_post_ra>
